<compile_context>
chip_gen: v6e
topology: v6e:2x2x1
jax: 0.10.0
libtpu: 0.0.40
codegen_flags: <defaults>
</compile_context>

<pallas_src>
import math

import jax
import jax.numpy as jnp
from jax.experimental import pallas as pl
from jax.experimental.pallas import tpu as pltpu

_INV_SQRT2 = 1.0 / math.sqrt(2.0)

# Per-generation defaults: token-tile size and the scoped-VMEM budget we are
# willing to request via vmem_limit_bytes (kept under physical VMEM).
_CHIP_CFG = {
    "v5e": dict(tm=256, vmem_budget=96 << 20),     # 128 MiB physical
    "v6e": dict(tm=1024, vmem_budget=96 << 20),    # 128 MiB physical
    "v7x": dict(tm=512, vmem_budget=48 << 20),     # 64 MiB physical
    "unknown": dict(tm=256, vmem_budget=32 << 20),
}


def _round_up(x, m):
    return ((x + m - 1) // m) * m


def _detect_chip():
    try:
        kind = jax.devices()[0].device_kind.lower()
    except Exception:  # defensive: never fail config selection
        return "unknown"
    if "v6" in kind:
        return "v6e"
    if "7x" in kind or "v7" in kind:
        return "v7x"
    if "v5" in kind:   # v5 lite / v5e (v5p handled conservatively the same)
        return "v5e"
    return "unknown"


def _pick_tk(F, cap=512):
    """Chunk size along the 4H intermediate: largest multiple of 128 <= cap
    that divides F (keeps the lane axis dense and the VMEM footprint bounded)."""
    if F <= cap:
        return F
    for t in range(cap, 127, -128):
        if F % t == 0:
            return t
    # TODO(synk): odd intermediate sizes fall back to un-chunked full-F blocks.
    return F


def _gelu_exact(h):
    # Exact (erf) GELU in f32, matching torch.nn.GELU() default.  Kept f32 for
    # exact module fidelity; with the weight-resident / large-tm configs the
    # MXU step is long enough to hide the VPU erf polynomial.
    return 0.5 * h * (1.0 + jax.lax.erf(h * _INV_SQRT2))


def _streaming_kernel(x_ref, w1_ref, b1_ref, w2_ref, b2_ref, o_ref, acc_ref):
    """K-streaming variant: grid=(tokens/tm, F/tk); weights streamed per tile.

    x_ref  : (tm, H)   bf16 token tile
    w1_ref : (H, tk)   bf16 fc1 weight chunk
    b1_ref : (1, tk)   f32  fc1 bias chunk
    w2_ref : (tk, H)   bf16 fc2 weight chunk
    b2_ref : (1, H)    f32  fc2 bias
    o_ref  : (tm, H)   output tile (written on the last K step)
    acc_ref: (tm, H)   f32 accumulator scratch (persists across the K axis)
    """
    k = pl.program_id(1)

    @pl.when(k == 0)
    def _():
        # Fold the fc2 bias into the accumulator init (saves an epilogue add).
        acc_ref[...] = jnp.zeros_like(acc_ref) + b2_ref[...]

    h = jnp.dot(x_ref[...], w1_ref[...], preferred_element_type=jnp.float32)
    h = _gelu_exact(h + b1_ref[...])
    acc_ref[...] += jnp.dot(h.astype(w2_ref.dtype), w2_ref[...],
                            preferred_element_type=jnp.float32)

    @pl.when(k == pl.num_programs(1) - 1)
    def _():
        # Dropout is the identity in eval mode.
        o_ref[...] = acc_ref[...].astype(o_ref.dtype)


def _make_resident_kernel(tk, nk):
    """Weight-resident variant: grid=(tokens/tm,).  W1/W2 are DMA'd once (their
    block index never changes) and the 4H axis is chunked with static slices."""

    def kernel(x_ref, w1_ref, b1_ref, w2_ref, b2_ref, o_ref, acc_ref):
        acc_ref[...] = jnp.zeros_like(acc_ref) + b2_ref[...]
        for c in range(nk):            # nk is small & static -> fully unrolled
            lo = c * tk
            h = jnp.dot(x_ref[...], w1_ref[:, lo:lo + tk],
                        preferred_element_type=jnp.float32)
            h = _gelu_exact(h + b1_ref[:, lo:lo + tk])
            acc_ref[...] += jnp.dot(h.astype(w2_ref.dtype),
                                    w2_ref[lo:lo + tk, :],
                                    preferred_element_type=jnp.float32)
        # Dropout is the identity in eval mode.
        o_ref[...] = acc_ref[...].astype(o_ref.dtype)

    return kernel


def gpt2_mlp(x, w1, b1, w2, b2, *, tm=None, tk=None, weight_resident=None,
             compute_dtype=jnp.bfloat16):
    """GPT-2 MLP forward: Dropout(fc2(GELU(fc1(x)))), eval-mode dropout.

    x : (B, S, H).  Weights pre-transposed vs torch.nn.Linear:
      w1: (H, 4H), b1: (4H,), w2: (4H, H), b2: (H,).  Returns (B, S, H).
    """
    B, S, H = x.shape
    F = w1.shape[1]
    assert w1.shape == (H, F) and w2.shape == (F, H)
    assert b1.shape == (F,) and b2.shape == (H,)
    M = B * S

    chip = _detect_chip()
    cfg = _CHIP_CFG[chip]
    budget = cfg["vmem_budget"]

    if tk is None:
        tk = _pick_tk(F)
    assert F % tk == 0, "tk must divide the intermediate size"

    # Token tile: per-chip roofline default, rounded to a multiple of 16
    # (bf16 sublane packing), clamped to the (padded) token count.
    if tm is None:
        tm = cfg["tm"]
    tm = max(16, min(tm, _round_up(M, 16)))
    if chip == "v7x":
        # Keep both TensorCores populated when there is enough work.
        while tm > 256 and _round_up(M, tm) // tm < 2:
            tm //= 2

    wd = jnp.dtype(compute_dtype).itemsize
    out_itemsize = jnp.dtype(x.dtype).itemsize

    def _est_vmem(tm_, resident):
        w_bytes = 2 * H * (F if resident else tk) * wd * 2   # double-buffered
        act = tm_ * H * wd * 2 + tm_ * H * out_itemsize * 2 + tm_ * H * 4
        inter = tm_ * tk * 6                                  # f32 h + bf16 copy
        bias = ((F if resident else tk) + H) * 4 * 2
        return w_bytes + act + inter + bias

    if weight_resident is None:
        # Resident weights are the biggest lever (HBM weight traffic cut by
        # grid_m) -- take it whenever they fit in the per-chip VMEM budget.
        weight_resident = _est_vmem(tm, True) <= int(0.85 * budget)

    while _est_vmem(tm, weight_resident) > budget and tm >= 32:
        tm //= 2
    tm = max(16, tm)

    Mp = _round_up(M, tm)
    grid_m = Mp // tm

    x2d = x.reshape(M, H)
    if Mp != M:
        x2d = jnp.pad(x2d, ((0, Mp - M), (0, 0)))

    # bf16 operands for the MXU; biases and accumulation stay f32.
    x_c = x2d.astype(compute_dtype)
    w1_c = w1.astype(compute_dtype)
    w2_c = w2.astype(compute_dtype)
    b1_2d = b1.reshape(1, F).astype(jnp.float32)
    b2_2d = b2.reshape(1, H).astype(jnp.float32)

    # CostEstimate reflecting actual HBM traffic: weights read once in the
    # resident variant, grid_m times in the streaming variant.
    weight_passes = 1 if weight_resident else grid_m
    cost = pl.CostEstimate(
        flops=4 * Mp * H * F,                 # 2*M*H*F (fc1) + 2*M*F*H (fc2)
        transcendentals=Mp * F,               # erf inside GELU
        bytes_accessed=(Mp * H * wd
                        + weight_passes * 2 * H * F * wd
                        + (F + H) * 4
                        + Mp * H * out_itemsize),
    )

    if weight_resident:
        kernel = _make_resident_kernel(tk, F // tk)
        grid = (grid_m,)
        in_specs = [
            pl.BlockSpec((tm, H), lambda i: (i, 0)),   # x tile
            pl.BlockSpec((H, F), lambda i: (0, 0)),    # W1 (resident)
            pl.BlockSpec((1, F), lambda i: (0, 0)),    # b1 (resident)
            pl.BlockSpec((F, H), lambda i: (0, 0)),    # W2 (resident)
            pl.BlockSpec((1, H), lambda i: (0, 0)),    # b2 (resident)
        ]
        out_spec = pl.BlockSpec((tm, H), lambda i: (i, 0))
        dim_sem = ("parallel",)
    else:
        kernel = _streaming_kernel
        grid = (grid_m, F // tk)
        in_specs = [
            pl.BlockSpec((tm, H), lambda i, k: (i, 0)),  # x tile
            pl.BlockSpec((H, tk), lambda i, k: (0, k)),  # W1 chunk
            pl.BlockSpec((1, tk), lambda i, k: (0, k)),  # b1 chunk
            pl.BlockSpec((tk, H), lambda i, k: (k, 0)),  # W2 chunk
            pl.BlockSpec((1, H), lambda i, k: (0, 0)),   # b2
        ]
        out_spec = pl.BlockSpec((tm, H), lambda i, k: (i, 0))
        dim_sem = ("parallel", "arbitrary")

    out = pl.pallas_call(
        kernel,
        out_shape=jax.ShapeDtypeStruct((Mp, H), x.dtype),
        grid_spec=pltpu.PrefetchScalarGridSpec(
            num_scalar_prefetch=0,
            grid=grid,
            in_specs=in_specs,
            out_specs=out_spec,
            scratch_shapes=[pltpu.VMEM((tm, H), jnp.float32)],
        ),
        compiler_params=pltpu.CompilerParams(
            dimension_semantics=dim_sem,
            vmem_limit_bytes=int(budget)),
        cost_estimate=cost,
    )(x_c, w1_c, b1_2d, w2_c, b2_2d)

    if Mp != M:
        out = out[:M]
    return out.reshape(B, S, H)


if __name__ == "__main__":
    # Small config consistent with the module: hidden_size=32 -> intermediate=128.
    B, S, H = 2, 8, 32
    key = jax.random.PRNGKey(0)
    kx, kw1, kb1, kw2, kb2 = jax.random.split(key, 5)

    x = jax.random.normal(kx, (B, S, H), dtype=jnp.float32)
    # Deterministic parameter init (roughly Linear-default scale).
    w1 = jax.random.normal(kw1, (H, 4 * H), dtype=jnp.float32) / math.sqrt(H)
    b1 = jax.random.normal(kb1, (4 * H,), dtype=jnp.float32) * 0.01
    w2 = jax.random.normal(kw2, (4 * H, H), dtype=jnp.float32) / math.sqrt(4 * H)
    b2 = jax.random.normal(kb2, (H,), dtype=jnp.float32) * 0.01

    # Exercise both execution variants.
    out_resident = gpt2_mlp(x, w1, b1, w2, b2, weight_resident=True)
    out_streamed = gpt2_mlp(x, w1, b1, w2, b2, weight_resident=False)
    jax.block_until_ready((out_resident, out_streamed))

    # Reference (eval-mode dropout = identity), using the same bf16 operand
    # rounding as the kernel so the comparison isolates structural bugs.
    f32 = jnp.float32
    xr = x.reshape(-1, H).astype(jnp.bfloat16).astype(f32)
    w1r = w1.astype(jnp.bfloat16).astype(f32)
    w2r = w2.astype(jnp.bfloat16).astype(f32)
    h_ref = xr @ w1r + b1
    h_ref = 0.5 * h_ref * (1.0 + jax.lax.erf(h_ref / math.sqrt(2.0)))
    h_ref = h_ref.astype(jnp.bfloat16).astype(f32)
    ref = (h_ref @ w2r + b2).reshape(B, S, H)

    assert jnp.allclose(out_resident, ref, atol=2e-2, rtol=2e-2), "resident mismatch"
    assert jnp.allclose(out_streamed, ref, atol=2e-2, rtol=2e-2), "streaming mismatch"
    print("KERNEL_OK")
</pallas_src>

<mosaic_0001>
module attributes {stable_mosaic.version = 11 : i64} {
  func.func @kernel(%arg0: i32, %arg1: memref<16x32xbf16, #tpu.memory_space<vmem>>, %arg2: memref<32x128xbf16, #tpu.memory_space<vmem>>, %arg3: memref<1x128xf32, #tpu.memory_space<vmem>>, %arg4: memref<128x32xbf16, #tpu.memory_space<vmem>>, %arg5: memref<1x32xf32, #tpu.memory_space<vmem>>, %arg6: memref<16x32xf32, #tpu.memory_space<vmem>>, %arg7: memref<16x32xf32, #tpu.memory_space<vmem>>) attributes {dimension_semantics = [#tpu.dimension_semantics<parallel>], iteration_bounds = array<i64: 1>, scalar_prefetch = 0 : i64, scratch_operands = 1 : i64, tpu.core_type = #tpu.core_type<tc>, window_params = [{transform_indices = @transform_0, window_bounds = array<i64: 16, 32>}, {pipeline_mode = #tpu.pipeline_mode<synchronous>, transform_indices = @transform_1, window_bounds = array<i64: 32, 128>}, {pipeline_mode = #tpu.pipeline_mode<synchronous>, transform_indices = @transform_2, window_bounds = array<i64: 1, 128>}, {pipeline_mode = #tpu.pipeline_mode<synchronous>, transform_indices = @transform_3, window_bounds = array<i64: 128, 32>}, {pipeline_mode = #tpu.pipeline_mode<synchronous>, transform_indices = @transform_4, window_bounds = array<i64: 1, 32>}, {transform_indices = @transform_5, window_bounds = array<i64: 16, 32>}]} {
    %cst = arith.constant 0.000000e+00 : f32
    %0 = vector.broadcast %cst : f32 to vector<16x32xf32>
    %c0 = arith.constant 0 : index
    %c0_0 = arith.constant 0 : index
    %1 = vector.load %arg5[%c0, %c0_0] : memref<1x32xf32, #tpu.memory_space<vmem>>, vector<1x32xf32>
    %2 = vector.broadcast %1 : vector<1x32xf32> to vector<16x32xf32>
    %3 = arith.addf %0, %2 : vector<16x32xf32>
    %c0_1 = arith.constant 0 : index
    %c0_2 = arith.constant 0 : index
    %4 = vector.load %arg7[%c0_1, %c0_2] : memref<16x32xf32, #tpu.memory_space<vmem>>, vector<16x32xf32>
    tpu.vector_store %arg7[%c0_1, %c0_2], %3 {strides = array<i32>} : memref<16x32xf32, #tpu.memory_space<vmem>>, vector<16x32xf32>,
    %c0_3 = arith.constant 0 : index
    %c0_4 = arith.constant 0 : index
    %5 = vector.load %arg1[%c0_3, %c0_4] : memref<16x32xbf16, #tpu.memory_space<vmem>>, vector<16x32xbf16>
    %c0_5 = arith.constant 0 : index
    %c0_6 = arith.constant 0 : index
    %6 = vector.load %arg2[%c0_5, %c0_6] : memref<32x128xbf16, #tpu.memory_space<vmem>>, vector<32x128xbf16>
    %cst_7 = arith.constant dense<0.000000e+00> : vector<16x128xf32>
    %7 = tpu.matmul %5, %6, %cst_7 {dimension_numbers = #tpu.dot_dimension_numbers<[1], [0], [0], [1], [0, 0, 1, 1], [], []>} : vector<16x32xbf16>, vector<32x128xbf16>, vector<16x128xf32> -> vector<16x128xf32>
    %c0_8 = arith.constant 0 : index
    %c0_9 = arith.constant 0 : index
    %8 = vector.load %arg3[%c0_8, %c0_9] : memref<1x128xf32, #tpu.memory_space<vmem>>, vector<1x128xf32>
    %9 = vector.broadcast %8 : vector<1x128xf32> to vector<16x128xf32>
    %10 = arith.addf %7, %9 : vector<16x128xf32>
    %cst_10 = arith.constant 5.000000e-01 : f32
    %11 = vector.broadcast %cst_10 : f32 to vector<16x128xf32>
    %12 = arith.mulf %11, %10 : vector<16x128xf32>
    %cst_11 = arith.constant 0.707106769 : f32
    %13 = vector.broadcast %cst_11 : f32 to vector<16x128xf32>
    %14 = arith.mulf %10, %13 : vector<16x128xf32>
    %15 = math.erf %14 : vector<16x128xf32>
    %cst_12 = arith.constant 1.000000e+00 : f32
    %16 = vector.broadcast %cst_12 : f32 to vector<16x128xf32>
    %17 = arith.addf %16, %15 : vector<16x128xf32>
    %18 = arith.mulf %12, %17 : vector<16x128xf32>
    %c0_13 = arith.constant 0 : index
    %c0_14 = arith.constant 0 : index
    %19 = vector.load %arg7[%c0_13, %c0_14] : memref<16x32xf32, #tpu.memory_space<vmem>>, vector<16x32xf32>
    %20 = arith.truncf %18 : vector<16x128xf32> to vector<16x128xbf16>
    %c0_15 = arith.constant 0 : index
    %c0_16 = arith.constant 0 : index
    %21 = vector.load %arg4[%c0_15, %c0_16] : memref<128x32xbf16, #tpu.memory_space<vmem>>, vector<128x32xbf16>
    %cst_17 = arith.constant dense<0.000000e+00> : vector<16x32xf32>
    %22 = tpu.matmul %20, %21, %cst_17 {dimension_numbers = #tpu.dot_dimension_numbers<[1], [0], [0], [1], [0, 0, 1, 1], [], []>} : vector<16x128xbf16>, vector<128x32xbf16>, vector<16x32xf32> -> vector<16x32xf32>
    %23 = arith.addf %19, %22 : vector<16x32xf32>
    %c0_18 = arith.constant 0 : index
    %c0_19 = arith.constant 0 : index
    %24 = vector.load %arg7[%c0_18, %c0_19] : memref<16x32xf32, #tpu.memory_space<vmem>>, vector<16x32xf32>
    tpu.vector_store %arg7[%c0_18, %c0_19], %23 {strides = array<i32>} : memref<16x32xf32, #tpu.memory_space<vmem>>, vector<16x32xf32>,
    %c0_20 = arith.constant 0 : index
    %c0_21 = arith.constant 0 : index
    %25 = vector.load %arg7[%c0_20, %c0_21] : memref<16x32xf32, #tpu.memory_space<vmem>>, vector<16x32xf32>
    %c0_22 = arith.constant 0 : index
    %c0_23 = arith.constant 0 : index
    %26 = vector.load %arg6[%c0_22, %c0_23] : memref<16x32xf32, #tpu.memory_space<vmem>>, vector<16x32xf32>
    tpu.vector_store %arg6[%c0_22, %c0_23], %25 {strides = array<i32>} : memref<16x32xf32, #tpu.memory_space<vmem>>, vector<16x32xf32>,
    return
  }
  func.func @transform_0(%arg0: i32) -> (i32, i32) {
    %c0_i32 = arith.constant 0 : i32
    %c0_i32_0 = arith.constant 0 : i32
    return %arg0, %c0_i32 : i32, i32
  }
  func.func @transform_1(%arg0: i32) -> (i32, i32) {
    %c0_i32 = arith.constant 0 : i32
    %c0_i32_0 = arith.constant 0 : i32
    %c0_i32_1 = arith.constant 0 : i32
    return %c0_i32, %c0_i32_0 : i32, i32
  }
  func.func @transform_2(%arg0: i32) -> (i32, i32) {
    %c0_i32 = arith.constant 0 : i32
    %c0_i32_0 = arith.constant 0 : i32
    %c0_i32_1 = arith.constant 0 : i32
    return %c0_i32, %c0_i32_0 : i32, i32
  }
  func.func @transform_3(%arg0: i32) -> (i32, i32) {
    %c0_i32 = arith.constant 0 : i32
    %c0_i32_0 = arith.constant 0 : i32
    %c0_i32_1 = arith.constant 0 : i32
    return %c0_i32, %c0_i32_0 : i32, i32
  }
  func.func @transform_4(%arg0: i32) -> (i32, i32) {
    %c0_i32 = arith.constant 0 : i32
    %c0_i32_0 = arith.constant 0 : i32
    %c0_i32_1 = arith.constant 0 : i32
    return %c0_i32, %c0_i32_0 : i32, i32
  }
  func.func @transform_5(%arg0: i32) -> (i32, i32) {
    %c0_i32 = arith.constant 0 : i32
    %c0_i32_0 = arith.constant 0 : i32
    return %arg0, %c0_i32 : i32, i32
  }
}

</mosaic_0001>

<bundles_post_ra>
// kernel: tpu_custom_call.1
= control target key start
LH: loop header
LB: loop body
LE: loop exit
PB: predicated region body
PF: predicated region fallthrough
CT: control target
= control target key end

     0   :  { %v345_v1 = vmov 0.0   ;;  %vm346_vm0 = vmmov 0   ;;  %vm30_vm1 = vcmask 261120   ;;  %s429_s0 = inlined_call_operand.vmem [shape: bf16[16,32], index: 0, kind: input, shape index: {}]   ;;  %s430_s1 = inlined_call_operand.vmem [shape: bf16[32,128], index: 1, kind: input, shape index: {}]   ;;  %s431_s2 = inlined_call_operand.vmem [shape: f32[1,128], index: 2, kind: input, shape index: {}]   ;;  %s432_s3 = inlined_call_operand.vmem [shape: bf16[128,32], index: 3, kind: input, shape index: {}]   ;;  %s433_s4 = inlined_call_operand.vmem [shape: f32[1,32], index: 4, kind: input, shape index: {}]   ;;  %s434_s5 = inlined_call_operand.hbm [shape: f32[16,32], index: 5, kind: output, shape index: {}]  }
   0x1   :  { %v308_v0 = vld [vmem:[%s430_s1 + $0x8] sm:$0xff]   ;;  %275 = vmatprep.subr.bf16.mxu0 %v345_v1  ;;  %283 = vmatprep.subr.bf16.mxu1 %v345_v1  ;;  %v309_v2 = vld [vmem:[%s430_s1] sm:$0xff]   ;;  %v311_v3 = vld [vmem:[%s432_s3 + $0x38] sm:$0xff]  }
   0x2   :  { %276 = vmatpush3.bf16.msra.mxu0 %v308_v0  ;;  %279 = vmatprep.mubr.msk.bf16.mxu0 %vm346_vm0, %v345_v1  ;;  %v310_v4 = vld [vmem:[%s429_s0] sm:$0xff]  }
   0x3   :  { %277 = vmatprep.subr.bf16.mxu0 %v345_v1  ;;  %299 = vmatprep.mubr.msk.bf16.mxu1 %vm346_vm0, %v345_v1 }
   0x4   :  { %284 = vmatpush3.bf16.msra.mxu1 %v311_v3 }
   0x5   :  { %285 = vmatprep.subr.bf16.mxu1 %v345_v1 }
   0x6   :  { %278 = vmatpush3.bf16.msra.mxu0 %v309_v2 }
   0x9   :  { %280 = vmatmul.mubr.msk.bf16.vlgmr.msra.gmra.mxu0 %vm30_vm1, %v310_v4 }
   0xa   :  { %10 = vsyncpa [#allocation4], 0  ;;  %v312_v5 = vld [vmem:[%s432_s3 + $0x30] sm:$0xff]   ;;  %v313_v6 = vld [vmem:[%s432_s3 + $0x28] sm:$0xff]  }
   0xb   :  { %286 = vmatpush3.bf16.msra.mxu1 %v312_v5  ;;  %v314_v7 = vld [vmem:[%s432_s3 + $0x20] sm:$0xff]   ;;  %v315_v8 = vld [vmem:[%s432_s3 + $0x18] sm:$0xff]   ;;  %v316_v9 = vld [vmem:[%s432_s3 + $0x10] sm:$0xff]  }
   0xc   :  { %287 = vmatprep.subr.bf16.mxu1 %v345_v1  ;;  %v317_v10 = vld [vmem:[%s432_s3 + $0x8] sm:$0xff]   ;;  %v318_v11 = vld [vmem:[%s432_s3] sm:$0xff]  }
   0xd   :  { %v249_v12 = vld [vmem:[%s433_s4] ss:$0 sm:$0xff] }
   0xe   :  { %31 = vst.msk [vmem:[#allocation2] sm:$0xff] %vm30_vm1, %v249_v12  ;;  %32 = vst.msk [vmem:[#allocation2 + $0x8] sm:$0xff] %vm30_vm1, %v249_v12  ;;  %v250_v13 = vld [vmem:[%s431_s2] ss:$0 sm:$0xff]  ;;  %s347_s2 = smov [#allocation3]  }
   0xf   :  { %288 = vmatpush3.bf16.msra.mxu1 %v313_v6  ;;  %s238_s3 = sshll.u32 %s347_s2, 4  ;;  %s239_s3 = int_to_ptr.vmem [resolvable:$true] %s238_s3 }
  0x10   :  { %289 = vmatprep.subr.bf16.mxu1 %v345_v1  ;;  %s323_s4 = scalar_lea.vmem %s239_s3, 256  ;;  %p328_p1 = scmp.lt.s32.totalorder %s239_s3, %s239_s3 }
  0x11   :  { %p324_p0 = scmp.ne.s32.totalorder %s239_s3, %s323_s4  ;;  %p329_p2 = scmp.lt.s32.totalorder %s323_s4, %s323_s4 }
  0x13   :  { %290 = vmatpush3.bf16.msra.mxu1 %v314_v7  ;;  %p330_p3 = por %p329_p2, %p328_p1 }
  0x14   :  { %291 = vmatprep.subr.bf16.mxu1 %v345_v1 }
  0x15   :  { %v117_v31 = vld [vmem:[#allocation2] sm:$0xff]  ;;  %v118_v35 = vld [vmem:[#allocation2 + $0x8] sm:$0xff]  ;;  %p331_p4 = pnand %p330_p3, %p324_p0 }
  0x17   :  { %292 = vmatpush3.bf16.msra.mxu1 %v315_v8 }
  0x18   :  { %293 = vmatprep.subr.bf16.mxu1 %v345_v1 }
  0x1b   :  { %294 = vmatpush3.bf16.msra.mxu1 %v316_v9 }
  0x1c   :  { %295 = vmatprep.subr.bf16.mxu1 %v345_v1 }
  0x1f   :  { %296 = vmatpush3.bf16.msra.mxu1 %v317_v10 }
  0x20   :  { %297 = vmatprep.subr.bf16.mxu1 %v345_v1 }
  0x23   :  { %298 = vmatpush3.bf16.msra.mxu1 %v318_v11 }
  0xc9   :  { %v100_v14 = vpop.f32.mrf.mxu0 }
  0xca   :  { %v101_v15 = vadd.f32 %v250_v13, %v100_v14 }
  0xcb   :  { %v281_v16 = vpop.f32.mrf.mxu0 }
  0xcc   :  { %v109_v17 = vmul.f32 0.70710677, %v101_v15  ;;  %v107_v25 = vmul.f32 0.5, %v101_v15 }
  0xcd   :  { %v103_v18 = vpop.f32.mrf.mxu0 }
  0xce   :  { %319 = verf.f32 %v109_v17  ;;  %v104_v19 = vadd.f32 %v250_v13, %v103_v18 }
  0xcf   :  { %v282_v20 = vpop.f32.mrf.mxu0 }
  0xd0   :  { %v110_v21 = vmul.f32 0.70710677, %v104_v19  ;;  %v108_v26 = vmul.f32 0.5, %v104_v19 }
  0xd2   :  { %321 = verf.f32 %v110_v21 }
  0xdb   :  { %v320_v22 = vpop.eup %319 }
  0xdc   :  { %v113_v23 = vadd.f32 1.0, %v320_v22 }
  0xde   :  { %v115_v28 = vmul.f32 %v113_v23, %v107_v25 }
  0xdf   :  { %v322_v24 = vpop.eup %321 }
  0xe0   :  { %v114_v27 = vadd.f32 1.0, %v322_v24 }
  0xe2   :  { %v116_v29 = vmul.f32 %v114_v27, %v108_v26 }
  0xe4   :  { %v119_v30 = vpack.c.bf16 %v116_v29, %v115_v28 }
  0xe6   :  { %300 = vmatmul.mubr.bf16.vlgmr.msra.gmra.mxu1 %v119_v30 }
 0x1a6   :  { %v218_v32 = vpop.f32.mrf.mxu1 }
 0x1a7   :  { %v225_v33 = vadd.f32 %v218_v32, %v117_v31 }
 0x1a8   :  { %v301_v34 = vpop.f32.mrf.mxu1 }
 0x1a9   :  { %227 = vst.msk [vmem:[#allocation2] sm:$0xff] %vm30_vm1, %v225_v33 }
 0x1aa   :  { %v221_v36 = vpop.f32.mrf.mxu1 }
 0x1ab   :  { %v226_v37 = vadd.f32 %v221_v36, %v118_v35 }
 0x1ac   :  { %v302_v38 = vpop.f32.mrf.mxu1 }
 0x1ad   :  { %228 = vst.msk [vmem:[#allocation2 + $0x8] sm:$0xff] %vm30_vm1, %v226_v37 }
 0x1b0   :  { %v229_v39 = vld [vmem:[#allocation2] sm:$0xff] }
 0x1b1   :  { %231 = vst.msk [vmem:[#allocation3] sm:$0xff] %vm30_vm1, %v229_v39 }
 0x1b4   :  { %v230_v40 = vld [vmem:[#allocation2 + $0x8] sm:$0xff] }
 0x1b5   :  { %232 = vst.msk [vmem:[#allocation3 + $0x8] sm:$0xff] %vm30_vm1, %v230_v40 }
 0x1b6   :  { %334 = shalt.err (!%p331_p4)
}
 0x1b7   :  { %s348_s17 = smov 128   ;;  %s349_s18 = smov 8  }
 0x1b8   :  { %244 = dma.vmem_to_hbm [thread:$0]  %s239_s3, 256, %s434_s5, [#allocation4], %s348_s17, %s348_s17, %s349_s18  }
 0x1b9   :  { %343 = dma.done.wait [#allocation4], 256  }
 0x1ba   :  { %344 = vsyncadd [#allocation4], 4294967040 }
 0x1bb   :  { %248 = vsyncpa [#allocation4], 1 }

</bundles_post_ra>
